<compile_context>
chip_gen: v5e
topology: v5e:2x2
jax: 0.10.0
libtpu: 0.0.40
codegen_flags: <defaults>
</compile_context>

<pallas_src>
import jax
import jax.numpy as jnp
from jax.experimental import pallas as pl
from jax.experimental.pallas import tpu as pltpu

H2_PAD = 128  # fc2 output / fc3 input padded from 64 -> 128 (lane-dense h2)


def _round_up(n, m):
    return ((n + m - 1) // m) * m


def _leaky_relu(x, negative_slope=0.01):
    return jnp.where(x > 0, x, negative_slope * x)


def simple_nn_kernel(x_ref, w1_ref, b1_ref, w2_ref, b2_ref, w3_ref, b3_ref, o_ref):
    # Cast x to bf16 in-kernel (input streams from HBM as f32, one pass only).
    x = x_ref[...].astype(jnp.bfloat16)

    # fc1 + leaky_relu : bf16 operands on the MXU, f32 accumulation + f32 epilogue.
    h1 = jnp.dot(x, w1_ref[...], preferred_element_type=jnp.float32)
    h1 = _leaky_relu(h1 + b1_ref[...])

    # dropout(p=0.2) in eval mode -> identity
    # TODO(synk): training-mode dropout would use pltpu.prng_seed/prng_random_bits.

    # fc2 + leaky_relu (output columns padded to 128; padded cols stay exactly 0)
    h2 = jnp.dot(h1.astype(jnp.bfloat16), w2_ref[...], preferred_element_type=jnp.float32)
    h2 = _leaky_relu(h2 + b2_ref[...])

    # fc3 + tanh (unpadded out_size columns; zero-padded w3 rows contribute nothing)
    h3 = jnp.dot(h2.astype(jnp.bfloat16), w3_ref[...], preferred_element_type=jnp.float32)
    o_ref[...] = jnp.tanh(h3 + b3_ref[...]).astype(o_ref.dtype)


def simple_nn_forward(x, params, *, tile_b=None):
    """x: (B, input_size) float32. params from init_params (bf16 weights, f32 biases).
    Returns (B, output_size) float32."""
    w1, b1 = params["w1"], params["b1"]
    w2, b2 = params["w2"], params["b2"]
    w3, b3 = params["w3"], params["b3"]
    out_size = w3.shape[1]

    B, in_size = x.shape

    if tile_b is None:
        if B <= 1024:
            # Tiny batch: single grid step, just round the tile to the sublane quantum.
            tile_b = max(8, _round_up(B, 8))
        else:
            # Large tiles amortize the ~0.35 us per-grid-step overhead; keep >=2 steps
            # so the "parallel" batch axis actually feeds both v7x TensorCores.
            tile_b = min(4096, _round_up(pl.cdiv(B, 2), 256))

    grid = (pl.cdiv(B, tile_b),)  # ragged last block is clipped by Pallas on store

    x_spec = pl.BlockSpec((tile_b, in_size), lambda i: (i, 0))
    out_spec = pl.BlockSpec((tile_b, out_size), lambda i: (i, 0))
    # Constant block index -> Pallas keeps weights/biases resident in VMEM across steps.
    resident = lambda shape: pl.BlockSpec(shape, lambda i: (0, 0))

    out = pl.pallas_call(
        simple_nn_kernel,
        out_shape=jax.ShapeDtypeStruct((B, out_size), jnp.float32),
        grid=grid,
        in_specs=[
            x_spec,
            resident(w1.shape), resident(b1.shape),
            resident(w2.shape), resident(b2.shape),
            resident(w3.shape), resident(b3.shape),
        ],
        out_specs=out_spec,
        compiler_params=pltpu.CompilerParams(
            dimension_semantics=("parallel",),  # shard batch tiles across TCs on v7x
        ),
    )(x, w1, b1, w2, b2, w3, b3)

    return out


def init_params(key, input_size, output_size):
    """Mimics PyTorch nn.Linear init U(-1/sqrt(fan_in), 1/sqrt(fan_in)).
    Weights stored pre-transposed as (in, out) in bf16; biases f32 as (1, out).
    fc2 output columns / fc3 input rows are zero-padded 64 -> 128 (inert padding)."""
    dims = [(input_size, 128), (128, 64), (64, output_size)]
    params = {"output_size": output_size}
    keys = jax.random.split(key, 2 * len(dims))
    for i, (fan_in, fan_out) in enumerate(dims):
        bound = 1.0 / (fan_in ** 0.5)
        w = jax.random.uniform(keys[2 * i], (fan_in, fan_out), jnp.float32, -bound, bound)
        b = jax.random.uniform(keys[2 * i + 1], (1, fan_out), jnp.float32, -bound, bound)
        if i == 1:  # pad fc2 output columns 64 -> 128 (leaky_relu(0 + 0) == 0)
            pad = H2_PAD - fan_out
            w = jnp.pad(w, ((0, 0), (0, pad)))
            b = jnp.pad(b, ((0, 0), (0, pad)))
        if i == 2:  # pad fc3 input rows 64 -> 128 (zero rows contribute nothing)
            pad = H2_PAD - fan_in
            w = jnp.pad(w, ((0, pad), (0, 0)))
        params[f"w{i + 1}"] = w.astype(jnp.bfloat16)
        params[f"b{i + 1}"] = b.astype(jnp.float32)
    return params


def _reference_forward(x, params):
    """Pure-JAX f32 reference (eval-mode dropout = identity) for a sanity check."""
    w1 = params["w1"].astype(jnp.float32); b1 = params["b1"]
    w2 = params["w2"].astype(jnp.float32); b2 = params["b2"]
    w3 = params["w3"].astype(jnp.float32); b3 = params["b3"]
    h = _leaky_relu(x @ w1 + b1)
    h = _leaky_relu(h @ w2 + b2)
    return jnp.tanh(h @ w3 + b3)


if __name__ == "__main__":
    key = jax.random.PRNGKey(0)
    k_x, k_p = jax.random.split(key)

    batch = 8
    input_size = 32
    output_size = 16

    x = jax.random.normal(k_x, (batch, input_size), jnp.float32)
    params = init_params(k_p, input_size, output_size)

    out = simple_nn_forward(x, params)
    jax.block_until_ready(out)

    assert out.shape == (batch, output_size)
    # tanh output is bounded
    assert bool(jnp.all(jnp.abs(out) <= 1.0))
    # matches the f32 reference within bf16 mixed-precision tolerance
    ref = _reference_forward(x, params)
    assert bool(jnp.allclose(out, ref, atol=7e-2, rtol=7e-2))

    print("KERNEL_OK")
</pallas_src>

<mosaic_0001>
module attributes {stable_mosaic.version = 11 : i64} {
  func.func @simple_nn_kernel(%arg0: i32, %arg1: memref<8x32xf32, #tpu.memory_space<vmem>>, %arg2: memref<32x128xbf16, #tpu.memory_space<vmem>>, %arg3: memref<1x128xf32, #tpu.memory_space<vmem>>, %arg4: memref<128x128xbf16, #tpu.memory_space<vmem>>, %arg5: memref<1x128xf32, #tpu.memory_space<vmem>>, %arg6: memref<128x16xbf16, #tpu.memory_space<vmem>>, %arg7: memref<1x16xf32, #tpu.memory_space<vmem>>, %arg8: memref<8x16xf32, #tpu.memory_space<vmem>>) attributes {dimension_semantics = [#tpu.dimension_semantics<parallel>], iteration_bounds = array<i64: 1>, scalar_prefetch = 0 : i64, scratch_operands = 0 : i64, tpu.core_type = #tpu.core_type<tc>, window_params = [{transform_indices = @transform_0, window_bounds = array<i64: 8, 32>}, {pipeline_mode = #tpu.pipeline_mode<synchronous>, transform_indices = @transform_1, window_bounds = array<i64: 32, 128>}, {pipeline_mode = #tpu.pipeline_mode<synchronous>, transform_indices = @transform_2, window_bounds = array<i64: 1, 128>}, {pipeline_mode = #tpu.pipeline_mode<synchronous>, transform_indices = @transform_3, window_bounds = array<i64: 128, 128>}, {pipeline_mode = #tpu.pipeline_mode<synchronous>, transform_indices = @transform_4, window_bounds = array<i64: 1, 128>}, {pipeline_mode = #tpu.pipeline_mode<synchronous>, transform_indices = @transform_5, window_bounds = array<i64: 128, 16>}, {pipeline_mode = #tpu.pipeline_mode<synchronous>, transform_indices = @transform_6, window_bounds = array<i64: 1, 16>}, {transform_indices = @transform_7, window_bounds = array<i64: 8, 16>}]} {
    %c0 = arith.constant 0 : index
    %c0_0 = arith.constant 0 : index
    %0 = vector.load %arg1[%c0, %c0_0] : memref<8x32xf32, #tpu.memory_space<vmem>>, vector<8x32xf32>
    %1 = arith.truncf %0 : vector<8x32xf32> to vector<8x32xbf16>
    %c0_1 = arith.constant 0 : index
    %c0_2 = arith.constant 0 : index
    %2 = vector.load %arg2[%c0_1, %c0_2] : memref<32x128xbf16, #tpu.memory_space<vmem>>, vector<32x128xbf16>
    %cst = arith.constant dense<0.000000e+00> : vector<8x128xf32>
    %3 = tpu.matmul %1, %2, %cst {dimension_numbers = #tpu.dot_dimension_numbers<[1], [0], [0], [1], [0, 0, 1, 1], [], []>} : vector<8x32xbf16>, vector<32x128xbf16>, vector<8x128xf32> -> vector<8x128xf32>
    %c0_3 = arith.constant 0 : index
    %c0_4 = arith.constant 0 : index
    %4 = vector.load %arg3[%c0_3, %c0_4] : memref<1x128xf32, #tpu.memory_space<vmem>>, vector<1x128xf32>
    %5 = vector.broadcast %4 : vector<1x128xf32> to vector<8x128xf32>
    %6 = arith.addf %3, %5 : vector<8x128xf32>
    %cst_5 = arith.constant 0.000000e+00 : f32
    %7 = vector.broadcast %cst_5 : f32 to vector<8x128xf32>
    %8 = arith.cmpf ogt, %6, %7 : vector<8x128xf32>
    %cst_6 = arith.constant 0.00999999977 : f32
    %9 = vector.broadcast %cst_6 : f32 to vector<8x128xf32>
    %10 = arith.mulf %9, %6 : vector<8x128xf32>
    %11 = arith.select %8, %6, %10 : vector<8x128xi1>, vector<8x128xf32>
    %12 = arith.truncf %11 : vector<8x128xf32> to vector<8x128xbf16>
    %c0_7 = arith.constant 0 : index
    %c0_8 = arith.constant 0 : index
    %13 = vector.load %arg4[%c0_7, %c0_8] : memref<128x128xbf16, #tpu.memory_space<vmem>>, vector<128x128xbf16>
    %cst_9 = arith.constant dense<0.000000e+00> : vector<8x128xf32>
    %14 = tpu.matmul %12, %13, %cst_9 {dimension_numbers = #tpu.dot_dimension_numbers<[1], [0], [0], [1], [0, 0, 1, 1], [], []>} : vector<8x128xbf16>, vector<128x128xbf16>, vector<8x128xf32> -> vector<8x128xf32>
    %c0_10 = arith.constant 0 : index
    %c0_11 = arith.constant 0 : index
    %15 = vector.load %arg5[%c0_10, %c0_11] : memref<1x128xf32, #tpu.memory_space<vmem>>, vector<1x128xf32>
    %16 = vector.broadcast %15 : vector<1x128xf32> to vector<8x128xf32>
    %17 = arith.addf %14, %16 : vector<8x128xf32>
    %cst_12 = arith.constant 0.000000e+00 : f32
    %18 = vector.broadcast %cst_12 : f32 to vector<8x128xf32>
    %19 = arith.cmpf ogt, %17, %18 : vector<8x128xf32>
    %cst_13 = arith.constant 0.00999999977 : f32
    %20 = vector.broadcast %cst_13 : f32 to vector<8x128xf32>
    %21 = arith.mulf %20, %17 : vector<8x128xf32>
    %22 = arith.select %19, %17, %21 : vector<8x128xi1>, vector<8x128xf32>
    %23 = arith.truncf %22 : vector<8x128xf32> to vector<8x128xbf16>
    %c0_14 = arith.constant 0 : index
    %c0_15 = arith.constant 0 : index
    %24 = vector.load %arg6[%c0_14, %c0_15] : memref<128x16xbf16, #tpu.memory_space<vmem>>, vector<128x16xbf16>
    %cst_16 = arith.constant dense<0.000000e+00> : vector<8x16xf32>
    %25 = tpu.matmul %23, %24, %cst_16 {dimension_numbers = #tpu.dot_dimension_numbers<[1], [0], [0], [1], [0, 0, 1, 1], [], []>} : vector<8x128xbf16>, vector<128x16xbf16>, vector<8x16xf32> -> vector<8x16xf32>
    %c0_17 = arith.constant 0 : index
    %c0_18 = arith.constant 0 : index
    %26 = vector.load %arg7[%c0_17, %c0_18] : memref<1x16xf32, #tpu.memory_space<vmem>>, vector<1x16xf32>
    %27 = vector.broadcast %26 : vector<1x16xf32> to vector<8x16xf32>
    %28 = arith.addf %25, %27 : vector<8x16xf32>
    %29 = math.tanh %28 : vector<8x16xf32>
    %c0_19 = arith.constant 0 : index
    %c0_20 = arith.constant 0 : index
    %30 = vector.load %arg8[%c0_19, %c0_20] : memref<8x16xf32, #tpu.memory_space<vmem>>, vector<8x16xf32>
    tpu.vector_store %arg8[%c0_19, %c0_20], %29 {strides = array<i32>} : memref<8x16xf32, #tpu.memory_space<vmem>>, vector<8x16xf32>,
    return
  }
  func.func @transform_0(%arg0: i32) -> (i32, i32) {
    %c0_i32 = arith.constant 0 : i32
    %c0_i32_0 = arith.constant 0 : i32
    return %arg0, %c0_i32 : i32, i32
  }
  func.func @transform_1(%arg0: i32) -> (i32, i32) {
    %c0_i32 = arith.constant 0 : i32
    %c0_i32_0 = arith.constant 0 : i32
    %c0_i32_1 = arith.constant 0 : i32
    return %c0_i32, %c0_i32_0 : i32, i32
  }
  func.func @transform_2(%arg0: i32) -> (i32, i32) {
    %c0_i32 = arith.constant 0 : i32
    %c0_i32_0 = arith.constant 0 : i32
    %c0_i32_1 = arith.constant 0 : i32
    return %c0_i32, %c0_i32_0 : i32, i32
  }
  func.func @transform_3(%arg0: i32) -> (i32, i32) {
    %c0_i32 = arith.constant 0 : i32
    %c0_i32_0 = arith.constant 0 : i32
    %c0_i32_1 = arith.constant 0 : i32
    return %c0_i32, %c0_i32_0 : i32, i32
  }
  func.func @transform_4(%arg0: i32) -> (i32, i32) {
    %c0_i32 = arith.constant 0 : i32
    %c0_i32_0 = arith.constant 0 : i32
    %c0_i32_1 = arith.constant 0 : i32
    return %c0_i32, %c0_i32_0 : i32, i32
  }
  func.func @transform_5(%arg0: i32) -> (i32, i32) {
    %c0_i32 = arith.constant 0 : i32
    %c0_i32_0 = arith.constant 0 : i32
    %c0_i32_1 = arith.constant 0 : i32
    return %c0_i32, %c0_i32_0 : i32, i32
  }
  func.func @transform_6(%arg0: i32) -> (i32, i32) {
    %c0_i32 = arith.constant 0 : i32
    %c0_i32_0 = arith.constant 0 : i32
    %c0_i32_1 = arith.constant 0 : i32
    return %c0_i32, %c0_i32_0 : i32, i32
  }
  func.func @transform_7(%arg0: i32) -> (i32, i32) {
    %c0_i32 = arith.constant 0 : i32
    %c0_i32_0 = arith.constant 0 : i32
    return %arg0, %c0_i32 : i32, i32
  }
}

</mosaic_0001>

<bundles_post_ra>
// kernel: tpu_custom_call.1
= control target key start
LH: loop header
LB: loop body
LE: loop exit
PB: predicated region body
PF: predicated region fallthrough
CT: control target
= control target key end

     0   :  { %12 = vsyncpa [#allocation3], 0  ;;  %s535_s0 = inlined_call_operand.vmem [shape: f32[8,32], index: 0, kind: input, shape index: {}]   ;;  %s536_s1 = inlined_call_operand.hbm [shape: bf16[32,128], index: 1, kind: input, shape index: {}]   ;;  %s537_s2 = inlined_call_operand.vmem [shape: f32[1,128], index: 2, kind: input, shape index: {}]   ;;  %s538_s3 = inlined_call_operand.vmem [shape: bf16[128,128], index: 3, kind: input, shape index: {}]   ;;  %s539_s4 = inlined_call_operand.vmem [shape: f32[1,128], index: 4, kind: input, shape index: {}]   ;;  %s540_s5 = inlined_call_operand.vmem [shape: bf16[128,16], index: 5, kind: input, shape index: {}]   ;;  %s541_s6 = inlined_call_operand.vmem [shape: f32[1,16], index: 6, kind: input, shape index: {}]   ;;  %s542_s7 = inlined_call_operand.hbm [shape: f32[8,16], index: 7, kind: output, shape index: {}]  }
   0x1   :  { %13 = vsyncpa [#allocation4], 0  ;;  %s20_s26 = sshll.u32 %s536_s1, 4  ;;  %s425_s27 = smov [#allocation2]   ;;  %s21_s26 = int_to_ptr.hbm [resolvable:$true] %s20_s26 }
   0x2   :  { %s22_s28 = sshll.u32 %s425_s27, 4  ;;  %s426_s29 = smov 64   ;;  %s23_s28 = int_to_ptr.vmem [resolvable:$true] %s22_s28 }
   0x3   :  { %s427_s30 = smov 4  }
   0x4   :  { %28 = dma.hbm_to_vmem [thread:$0]  %s21_s26, 256, %s23_s28, [#allocation3], %s426_s29, %s426_s29, %s427_s30  }
   0x5   :  { %421 = dma.done.wait [#allocation3], 256  }
   0x6   :  { %422 = vsyncadd [#allocation3], 4294967040  ;;  %v347_v0 = vld [vmem:[#allocation2 + $0x8] sm:$0xff]  ;;  %v355_v1 = vld [vmem:[%s538_s3 + $0x38] sm:$0xff]  ;;  %vm66_vm0 = vcmask 261120   ;;  %vm254_vm3 = vcmask 130048  }
   0x7   :  { %76 = vmatpush.bf16.msra.mxu0 %v347_v0  ;;  %v346_v2 = vld [vmem:[#allocation2] sm:$0xff]  ;;  %155 = vmatpush.bf16.msra.mxu1 %v355_v1  ;;  %v354_v4 = vld [vmem:[%s538_s3 + $0x30] sm:$0xff]  ;;  %v353_v6 = vld [vmem:[%s538_s3 + $0x28] sm:$0xff] }
   0x8   :  { %v44_v3 = vld [vmem:[%s535_s0] sm:$0xff]  ;;  %v351_v8 = vld [vmem:[%s538_s3 + $0x18] sm:$0xff]  ;;  %v350_v9 = vld [vmem:[%s538_s3 + $0x10] sm:$0xff] }
   0x9   :  { %v45_v5 = vpack.c.bf16 %v44_v3, %v44_v3  ;;  %v352_v7 = vld [vmem:[%s538_s3 + $0x20] sm:$0xff]  ;;  %v349_v10 = vld [vmem:[%s538_s3 + $0x8] sm:$0xff]  ;;  %v363_v12 = vld [vmem:[%s540_s5 + $0x38] sm:$0xff] }
   0xa   :  { %v348_v11 = vld [vmem:[%s538_s3] sm:$0xff]  ;;  %240 = vmatpush.bf16.msra.mxu2 %v363_v12  ;;  %v362_v13 = vld [vmem:[%s540_s5 + $0x30] sm:$0xff]  ;;  %v361_v14 = vld [vmem:[%s540_s5 + $0x28] sm:$0xff] }
   0xb   :  { %77 = vmatpush.bf16.msra.mxu0 %v346_v2  ;;  %156 = vmatpush.bf16.msra.mxu1 %v354_v4  ;;  %v360_v15 = vld [vmem:[%s540_s5 + $0x20] sm:$0xff]  ;;  %v359_v16 = vld [vmem:[%s540_s5 + $0x18] sm:$0xff]  ;;  %v358_v17 = vld [vmem:[%s540_s5 + $0x10] sm:$0xff] }
   0xc   :  { %v368_v18 = vld [vmem:[%s537_s2] ss:$0 sm:$0xff]  ;;  %v357_v25 = vld [vmem:[%s540_s5 + $0x8] sm:$0xff] }
   0xd   :  { %v356_v26 = vld [vmem:[%s540_s5] sm:$0xff]  ;;  %s428_s5 = smov [#allocation5]  }
   0xe   :  { %281 = vmatmul.msk.bf16.vlgmr.msra.gmra.mxu0 %vm66_vm0, %v45_v5  ;;  %241 = vmatpush.bf16.msra.mxu2 %v362_v13  ;;  %v369_v27 = vld [vmem:[%s539_s4] ss:$0 sm:$0xff]  ;;  %s261_s19 = sshll.u32 %s428_s5, 4  ;;  %s263_s4 = sshll.u32 %s542_s7, 4  ;;  %s262_s19 = int_to_ptr.vmem [resolvable:$true] %s261_s19  ;;  %s264_s4 = int_to_ptr.hbm [resolvable:$true] %s263_s4 }
   0xf   :  { %157 = vmatpush.bf16.msra.mxu1 %v353_v6  ;;  %v370_v34 = vld [vmem:[%s541_s6] ss:$0 sm:$0xff] }
  0x12   :  { %242 = vmatpush.bf16.msra.mxu2 %v361_v14 }
  0x13   :  { %158 = vmatpush.bf16.msra.mxu1 %v352_v7 }
  0x16   :  { %243 = vmatpush.bf16.msra.mxu2 %v360_v15 }
  0x17   :  { %159 = vmatpush.bf16.msra.mxu1 %v351_v8 }
  0x1a   :  { %244 = vmatpush.bf16.msra.mxu2 %v359_v16 }
  0x1b   :  { %160 = vmatpush.bf16.msra.mxu1 %v350_v9 }
  0x1e   :  { %245 = vmatpush.bf16.msra.mxu2 %v358_v17 }
  0x1f   :  { %161 = vmatpush.bf16.msra.mxu1 %v349_v10 }
  0x22   :  { %246 = vmatpush.bf16.msra.mxu2 %v357_v25 }
  0x23   :  { %162 = vmatpush.bf16.msra.mxu1 %v348_v11 }
  0x26   :  { %247 = vmatpush.bf16.msra.mxu2 %v356_v26 }
  0x8b   :  { %v79_v19 = vpop.f32.mrf.mxu0 }
  0x8c   :  { %v80_v20 = vadd.f32 %v368_v18, %v79_v19 }
  0x8e   :  { %v84_v21 = vmul.f32 0.01, %v80_v20  ;;  %vm83_vm1 = vcmp.gt.f32.partialorder %v80_v20, 0.0 }
  0x90   :  { %v85_v22 = vsel %vm83_vm1, %v80_v20, %v84_v21 }
  0x91   :  { %v86_v23 = vpack.c.bf16 %v85_v22, %v85_v22 }
  0x93   :  { %v81_v24 = vpop.f32.mrf.mxu0  ;;  %163 = vmatmul.bf16.vlgmr.msra.gmra.mxu1 %v86_v23 }
 0x110   :  { %v164_v28 = vpop.f32.mrf.mxu1 }
 0x111   :  { %v165_v29 = vadd.f32 %v369_v27, %v164_v28 }
 0x113   :  { %v169_v30 = vmul.f32 0.01, %v165_v29  ;;  %vm168_vm2 = vcmp.gt.f32.partialorder %v165_v29, 0.0 }
 0x115   :  { %v170_v31 = vsel %vm168_vm2, %v165_v29, %v169_v30 }
 0x116   :  { %v171_v32 = vpack.c.bf16 %v170_v31, %v170_v31 }
 0x118   :  { %v166_v33 = vpop.f32.mrf.mxu1  ;;  %248 = vmatmul.bf16.vlgmr.msra.gmra.mxu2 %v171_v32 }
 0x19b   :  { %v249_v35 = vpop.f32.mrf.mxu2 }
 0x19c   :  { %v250_v36 = vadd.f32 %v370_v34, %v249_v35 }
 0x19e   :  { %371 = vtanh.f32 %v250_v36 }
 0x1a3   :  { %v251_v37 = vpop.f32.mrf.mxu2 }
 0x1a4   :  { %v372_v38 = vpop.eup %371 }
 0x1a5   :  { %255 = vst.msk [vmem:[#allocation5] sm:$0xff] %vm254_vm3, %v372_v38 }
 0x1a6   :  { %266 = dma.vmem_to_hbm [thread:$0]  %s262_s19, 128, %s264_s4, [#allocation4]  }
 0x1a7   :  { %423 = dma.done.wait [#allocation4], 128  }
 0x1a8   :  { %424 = vsyncadd [#allocation4], 4294967168 }
 0x1a9   :  { %271 = vsyncpa [#allocation3], 1 }
 0x1aa   :  { %272 = vsyncpa [#allocation4], 1 }

</bundles_post_ra>
